<compile_context>
chip_gen: v7x
topology: tpu7x:2x2x1
jax: 0.10.0
libtpu: 0.0.40
codegen_flags: <defaults>
</compile_context>

<pallas_src>
import math

import jax
import jax.numpy as jnp
from jax.experimental import pallas as pl
from jax.experimental.pallas import tpu as pltpu


_VMEM_TARGET_BYTES = 48 * 1024 * 1024   # fits raised scoped-VMEM on v5e/v6e/v7x
_VMEM_FLOOR_BYTES = 16 * 1024 * 1024


def _pe_add_kernel(idx_ref, x_ref, pe_ref, o_ref):
    """One row-tile: o = x + pe[idx], exact one-hot gather on the MXU.

    idx_ref: (TM, 1) int32  VMEM -- per-row time index
    x_ref:   (TM, D)        VMEM -- input rows
    pe_ref:  (max_len, D)   VMEM -- full pe table (same block every grid step)
    o_ref:   (TM, D)        VMEM -- output rows (HBM-aliased onto x)
    """
    tm = x_ref.shape[0]
    max_len = pe_ref.shape[0]

    # Clamp in-kernel.  Intentional deviation from PyTorch (which would raise
    # on out-of-range indices); also neutralizes garbage indices in the padded
    # tail block, whose output rows are dropped by the masked store anyway.
    idx = jnp.clip(idx_ref[...].astype(jnp.int32), 0, max_len - 1)      # (TM, 1)

    # Exact gather: one-hot (TM, max_len) @ pe (max_len, D) on the MXU.
    # HIGHEST precision keeps the f32 pe rows exact to ~1 ulp (each one-hot row
    # has a single exact 1.0, so the multi-pass decomposition of pe is simply
    # reassembled in the f32 accumulator).
    iota = jax.lax.broadcasted_iota(jnp.int32, (tm, max_len), 1)
    onehot = (iota == idx).astype(jnp.float32)
    pe_rows = jnp.dot(onehot, pe_ref[...],
                      precision=jax.lax.Precision.HIGHEST,
                      preferred_element_type=jnp.float32)                # (TM, D)

    o_ref[...] = x_ref[...] + pe_rows.astype(o_ref.dtype)


def _vmem_budget_bytes(tm: int, max_len: int, d: int) -> int:
    """Conservative per-call VMEM estimate (pe counted double-buffered)."""
    pe_b = 2 * max_len * d * 4
    x_b = 2 * tm * d * 4
    o_b = 2 * tm * d * 4
    idx_b = 2 * tm * 128 * 4          # (tm, 1) block padded to 128 lanes
    onehot_b = tm * max_len * 4       # f32 one-hot intermediate
    margin = 2 * 1024 * 1024
    return pe_b + x_b + o_b + idx_b + onehot_b + margin


def _pick_tm(rows: int, d: int, max_len: int, requested: int) -> int:
    # Target >= ~2 MiB of x per tile per direction (hides ~0.35 us/step grid
    # overhead even at v7x's 3.2 TB/s HBM); multiple of 8 sublanes.
    tm = max(requested, (2 * 1024 * 1024) // (4 * d))
    tm = max(8, (tm // 8) * 8)
    if tm > rows:
        tm = rows                     # single full-extent block (always legal)
    # Shrink until the conservative VMEM budget fits the scoped-VMEM target.
    while tm > 8 and _vmem_budget_bytes(tm, max_len, d) > _VMEM_TARGET_BYTES:
        tm = max(8, ((tm // 2) // 8) * 8)
    return tm


def make_pe_table(d_model: int, max_len: int) -> jnp.ndarray:
    """(max_len, d_model) sin/cos table, exactly as the PyTorch __init__."""
    position = jnp.arange(max_len, dtype=jnp.float32)[:, None]            # (max_len, 1)
    div_term = jnp.exp(
        jnp.arange(0, d_model, 2, dtype=jnp.float32) * (-math.log(10000.0) / d_model)
    )                                                                      # (d_model//2,)
    angles = position * div_term                                           # (max_len, d_model//2)
    pe = jnp.zeros((max_len, d_model), dtype=jnp.float32)
    pe = pe.at[:, 0::2].set(jnp.sin(angles))
    pe = pe.at[:, 1::2].set(jnp.cos(angles))
    return pe


def positional_encoding_forward(x: jnp.ndarray,
                                time_indices: jnp.ndarray,
                                pe: jnp.ndarray,
                                *,
                                tm: int = 512) -> jnp.ndarray:
    """x: (seq_len, batch, d_model) f32
       time_indices: (seq_len, batch, 1) integer-valued
       pe: (max_len, d_model) f32
       returns: (seq_len, batch, d_model) f32
    """
    S, B, D = x.shape
    max_len = pe.shape[0]
    R = S * B

    x_rows = x.reshape(R, D)                       # free (contiguous) reshape
    idx_rows = time_indices.reshape(R, 1)
    if idx_rows.dtype != jnp.int32:
        idx_rows = idx_rows.astype(jnp.int32)

    tm = _pick_tm(R, D, max_len, tm)
    grid = (pl.cdiv(R, tm),)                       # ragged tail: Pallas masks it
    vmem_limit = int(min(max(_vmem_budget_bytes(tm, max_len, D),
                             _VMEM_FLOOR_BYTES),
                         _VMEM_TARGET_BYTES))

    out_rows = pl.pallas_call(
        _pe_add_kernel,
        out_shape=jax.ShapeDtypeStruct((R, D), x.dtype),
        grid=grid,
        in_specs=[
            # per-tile time indices
            pl.BlockSpec((tm, 1), lambda i: (i, 0)),
            # input row tile
            pl.BlockSpec((tm, D), lambda i: (i, 0)),
            # full pe table, same block every step -> VMEM-resident
            # (v7x note: if lowered MLIR shows 2 buffers for this constant-index
            #  spec, switch to a one-shot manual DMA into scratch.)
            pl.BlockSpec((max_len, D), lambda i: (0, 0)),
        ],
        out_specs=pl.BlockSpec((tm, D), lambda i: (i, 0)),
        input_output_aliases={1: 0},               # in-place add on x rows
        compiler_params=pltpu.CompilerParams(
            dimension_semantics=("parallel",),
            vmem_limit_bytes=vmem_limit,
        ),
    )(idx_rows, x_rows, pe)

    return out_rows.reshape(S, B, D)


def positional_encoding_reference(x, time_indices, pe):
    """Pure-JAX reference of the intended PyTorch semantics."""
    idx = time_indices[..., 0].astype(jnp.int32)   # (S, B)
    return x + pe[idx]                             # gather + broadcast add


if __name__ == "__main__":
    seq_len, batch, d_model, max_len = 8, 2, 128, 64

    key = jax.random.PRNGKey(0)
    kx, ki = jax.random.split(key)
    x = jax.random.normal(kx, (seq_len, batch, d_model), dtype=jnp.float32)
    time_indices = jax.random.randint(
        ki, (seq_len, batch, 1), minval=0, maxval=max_len, dtype=jnp.int32
    )

    pe = make_pe_table(d_model, max_len)

    out = positional_encoding_forward(x, time_indices, pe)
    out = jax.block_until_ready(out)

    ref = positional_encoding_reference(x, time_indices, pe)
    assert out.shape == (seq_len, batch, d_model)
    assert jnp.allclose(out, ref, atol=1e-6, rtol=1e-6), "mismatch vs reference"

    print("KERNEL_OK")
</pallas_src>

<mosaic_0001>
module attributes {stable_mosaic.version = 11 : i64} {
  func.func @_pe_add_kernel(%arg0: i32, %arg1: memref<16x1xi32, #tpu.memory_space<vmem>>, %arg2: memref<16x128xf32, #tpu.memory_space<vmem>>, %arg3: memref<64x128xf32, #tpu.memory_space<vmem>>, %arg4: memref<16x128xf32, #tpu.memory_space<vmem>>) attributes {dimension_semantics = [#tpu.dimension_semantics<parallel>], iteration_bounds = array<i64: 1>, scalar_prefetch = 0 : i64, scratch_operands = 0 : i64, tpu.core_type = #tpu.core_type<tc>, window_params = [{transform_indices = @transform_0, window_bounds = array<i64: 16, 1>}, {transform_indices = @transform_1, window_bounds = array<i64: 16, 128>}, {pipeline_mode = #tpu.pipeline_mode<synchronous>, transform_indices = @transform_2, window_bounds = array<i64: 64, 128>}, {transform_indices = @transform_3, window_bounds = array<i64: 16, 128>}]} {
    %c0 = arith.constant 0 : index
    %c0_0 = arith.constant 0 : index
    %0 = vector.load %arg1[%c0, %c0_0] : memref<16x1xi32, #tpu.memory_space<vmem>>, vector<16x1xi32>
    %c0_i32 = arith.constant 0 : i32
    %c63_i32 = arith.constant 63 : i32
    %1 = vector.broadcast %c0_i32 : i32 to vector<16x1xi32>
    %2 = arith.maxsi %1, %0 : vector<16x1xi32>
    %3 = vector.broadcast %c63_i32 : i32 to vector<16x1xi32>
    %4 = arith.minsi %3, %2 : vector<16x1xi32>
    %5 = tpu.iota {dimensions = array<i32: 1>} : vector<16x64xi32>
    %6 = vector.broadcast %4 : vector<16x1xi32> to vector<16x64xi32>
    %7 = arith.cmpi eq, %5, %6 : vector<16x64xi32>
    %8 = arith.extui %7 : vector<16x64xi1> to vector<16x64xi32>
    %9 = arith.sitofp %8 : vector<16x64xi32> to vector<16x64xf32>
    %c0_1 = arith.constant 0 : index
    %c0_2 = arith.constant 0 : index
    %10 = vector.load %arg3[%c0_1, %c0_2] : memref<64x128xf32, #tpu.memory_space<vmem>>, vector<64x128xf32>
    %cst = arith.constant dense<0.000000e+00> : vector<16x128xf32>
    %11 = tpu.matmul %9, %10, %cst {dimension_numbers = #tpu.dot_dimension_numbers<[1], [0], [0], [1], [0, 0, 1, 1], [], []>, precision = #tpu.contract_precision<fp32>} : vector<16x64xf32>, vector<64x128xf32>, vector<16x128xf32> -> vector<16x128xf32>
    %c0_3 = arith.constant 0 : index
    %c0_4 = arith.constant 0 : index
    %12 = vector.load %arg2[%c0_3, %c0_4] : memref<16x128xf32, #tpu.memory_space<vmem>>, vector<16x128xf32>
    %13 = arith.addf %12, %11 : vector<16x128xf32>
    %c0_5 = arith.constant 0 : index
    %c0_6 = arith.constant 0 : index
    %14 = vector.load %arg4[%c0_5, %c0_6] : memref<16x128xf32, #tpu.memory_space<vmem>>, vector<16x128xf32>
    tpu.vector_store %arg4[%c0_5, %c0_6], %13 {strides = array<i32>} : memref<16x128xf32, #tpu.memory_space<vmem>>, vector<16x128xf32>,
    return
  }
  func.func @transform_0(%arg0: i32) -> (i32, i32) {
    %c0_i32 = arith.constant 0 : i32
    %c0_i32_0 = arith.constant 0 : i32
    return %arg0, %c0_i32 : i32, i32
  }
  func.func @transform_1(%arg0: i32) -> (i32, i32) {
    %c0_i32 = arith.constant 0 : i32
    %c0_i32_0 = arith.constant 0 : i32
    return %arg0, %c0_i32 : i32, i32
  }
  func.func @transform_2(%arg0: i32) -> (i32, i32) {
    %c0_i32 = arith.constant 0 : i32
    %c0_i32_0 = arith.constant 0 : i32
    %c0_i32_1 = arith.constant 0 : i32
    return %c0_i32, %c0_i32_0 : i32, i32
  }
  func.func @transform_3(%arg0: i32) -> (i32, i32) {
    %c0_i32 = arith.constant 0 : i32
    %c0_i32_0 = arith.constant 0 : i32
    return %arg0, %c0_i32 : i32, i32
  }
}

</mosaic_0001>

<bundles_post_ra>
// kernel: tpu_custom_call.1
= control target key start
LH: loop header
LB: loop body
LE: loop exit
PB: predicated region body
PF: predicated region fallthrough
CT: control target
= control target key end

     0   :  { %8 = vsyncpa [#allocation3], 0  ;;  %s1176_s0 = inlined_call_operand.vmem [shape: s32[16,1], index: 0, kind: input, shape index: {}]   ;;  %s1177_s1 = inlined_call_operand.hbm [shape: f32[16,128], index: 1, kind: input, shape index: {}, may-alias: {1,3}]   ;;  %s1178_s2 = inlined_call_operand.hbm [shape: f32[64,128], index: 2, kind: input, shape index: {}]   ;;  %s1179_s3 = inlined_call_operand.hbm [shape: f32[16,128], index: 3, kind: output, shape index: {}, may-alias: {1,3}]  }
   0x1   :  { %9 = vsyncpa [#allocation6], 0 }
   0x2   :  { %10 = vsyncpa [#allocation4], 0  ;;  %s1054_s12 = smov [#allocation2]   ;;  %s982_s16 = scalar_lea.hbm %s1177_s1, 256 }
   0x3   :  { %s18_s13 = sshll.u32 %s1054_s12, 4  ;;  %p983_p0 = scmp.ne.s32.totalorder %s1177_s1, %s982_s16  ;;  %s19_s13 = int_to_ptr.vmem [resolvable:$true] %s18_s13 }
   0x4   :  { %p986_p1 = scmp.lt.u32.totalorder %s982_s16, %s1177_s1 }
   0x6   :  { %p988_p2 = pnand %p986_p1, %p983_p0 }
   0x8   :  { %991 = shalt.err (!%p988_p2)
}
   0x9   :  { %s992_s21 = scalar_lea.vmem %s19_s13, 256  ;;  %p997_p4 = scmp.lt.s32.totalorder %s19_s13, %s19_s13 }
   0xa   :  { %p993_p3 = scmp.ne.s32.totalorder %s19_s13, %s992_s21  ;;  %p998_p5 = scmp.lt.s32.totalorder %s992_s21, %s992_s21 }
   0xc   :  { %p999_p6 = por %p998_p5, %p997_p4 }
   0xe   :  { %p1000_p7 = pnand %p999_p6, %p993_p3 }
  0x10   :  { %1003 = shalt.err (!%p1000_p7)
}
  0x11   :  { %s1055_s22 = smov 128   ;;  %s1056_s23 = smov 8  }
  0x12   :  { %24 = dma.hbm_to_vmem [thread:$0]  %s1177_s1, 256, %s19_s13, [#allocation3], %s1055_s22, %s1055_s22, %s1056_s23  }
  0x13   :  { %s1057_s26 = smov [#allocation5]   ;;  %s1004_s30 = scalar_lea.hbm %s1178_s2, 1024 }
  0x14   :  { %s30_s27 = sshll.u32 %s1057_s26, 4  ;;  %p1005_p8 = scmp.ne.s32.totalorder %s1178_s2, %s1004_s30  ;;  %s31_s27 = int_to_ptr.vmem [resolvable:$true] %s30_s27 }
  0x15   :  { %p1008_p9 = scmp.lt.u32.totalorder %s1004_s30, %s1178_s2 }
  0x17   :  { %p1010_p10 = pnand %p1008_p9, %p1005_p8 }
  0x19   :  { %1013 = shalt.err (!%p1010_p10)
}
  0x1a   :  { %s1014_s8 = scalar_lea.vmem %s31_s27, 1024  ;;  %p1019_p12 = scmp.lt.s32.totalorder %s31_s27, %s31_s27 }
  0x1b   :  { %p1015_p11 = scmp.ne.s32.totalorder %s31_s27, %s1014_s8  ;;  %p1020_p13 = scmp.lt.s32.totalorder %s1014_s8, %s1014_s8 }
  0x1d   :  { %p1021_p0 = por %p1020_p13, %p1019_p12 }
  0x1f   :  { %p1022_p1 = pnand %p1021_p0, %p1015_p11 }
  0x21   :  { %1025 = shalt.err (!%p1022_p1)
}
  0x22   :  { %36 = dma.hbm_to_vmem [thread:$0]  %s1178_s2, 1024, %s31_s27, [#allocation6], %s1055_s22, %s1055_s22, %s1056_s23  }
  0x23   :  { %1048 = dma.done.wait [#allocation3], 256  }
  0x24   :  { %1049 = vsyncadd [#allocation3], 4294967040 }
  0x25   :  { %1050 = dma.done.wait [#allocation6], 1024  }
  0x26   :  { %1051 = vsyncadd [#allocation6], 4294966272  ;;  %v1058_v0 = vmov 0   ;;  %v43_v1 = vld [vmem:[%s1176_s0] sm:$0xff]  ;;  %v44_v2 = vld [vmem:[%s1176_s0 + $0x8] sm:$0xff]  ;;  %vm75_vm4 = vcmask 523264  }
  0x27   :  { %981 = vset.pattern.permute.xlu0 %v1058_v0  ;;  %v67_v3 = vld [vmem:[#allocation5] sm:$0xff]  ;;  %vm45_vm0 = vcmp.gt.s32.totalorder %v43_v1, 0  ;;  %vm47_vm1 = vcmp.gt.s32.totalorder %v44_v2, 0  ;;  %v68_v4 = vld [vmem:[#allocation5 + $0x8] sm:$0xff]  ;;  %v69_v6 = vld [vmem:[#allocation5 + $0x10] sm:$0xff]  ;;  %s1060_s0 = smov [#allocation7]  }
  0x28   :  { %v83_v5 = vand.u32 4294901760, %v67_v3  ;;  %v70_v7 = vld [vmem:[#allocation5 + $0x18] sm:$0xff]  ;;  %v46_v8 = vsel %vm45_vm0, %v43_v1, 0  ;;  %v48_v9 = vsel %vm47_vm1, %v44_v2, 0  ;;  %v86_v10 = vand.u32 4294901760, %v68_v4  ;;  %v71_v12 = vld [vmem:[#allocation5 + $0x20] sm:$0xff] }
  0x29   :  { %v89_v11 = vand.u32 4294901760, %v69_v6  ;;  %v72_v13 = vld [vmem:[#allocation5 + $0x28] sm:$0xff]  ;;  %vm49_vm2 = vcmp.lt.s32.totalorder %v46_v8, 63  ;;  %vm51_vm3 = vcmp.lt.s32.totalorder %v48_v9, 63  ;;  %v92_v14 = vand.u32 4294901760, %v70_v7  ;;  %v73_v21 = vld [vmem:[#allocation5 + $0x30] sm:$0xff] }
  0x2a   :  { %v50_v15 = vsel %vm49_vm2, %v46_v8, 63  ;;  %v1117_v16 = vpack.c.bf16 %v86_v10, %v83_v5  ;;  %v95_v17 = vand.u32 4294901760, %v71_v12  ;;  %v98_v18 = vand.u32 4294901760, %v72_v13  ;;  %v74_v22 = vld [vmem:[#allocation5 + $0x38] sm:$0xff]  ;;  %s673_s2 = sshll.u32 %s1060_s0, 4  ;;  %s674_s2 = int_to_ptr.vmem [resolvable:$true] %s673_s2 }
  0x2b   :  { %56 = vperm.xlu0 %981, %v50_v15   ;;  %v1119_v19 = vpack.c.bf16 %v92_v14, %v89_v11  ;;  %v52_v20 = vsel %vm51_vm3, %v48_v9, 63  ;;  %v101_v24 = vand.u32 4294901760, %v73_v21  ;;  %v104_v25 = vand.u32 4294901760, %v74_v22  ;;  %s1026_s14 = scalar_lea.vmem %s674_s2, 256  ;;  %p1031_p3 = scmp.lt.s32.totalorder %s674_s2, %s674_s2 }
  0x2c   :  { %917 = vmatprep.subr.bf16.mxu0 %v1117_v16  ;;  %869 = vmatprep.subr.bf16.mxu1 %v1117_v16  ;;  %v1127_v23 = vpack.c.bf16 %v98_v18, %v95_v17  ;;  %v177_v26 = vsub.f32 %v67_v3, %v83_v5  ;;  %v184_v27 = vsub.f32 %v68_v4, %v86_v10  ;;  %v1059_v10 = vmov 0.0   ;;  %p1027_p2 = scmp.ne.s32.totalorder %s674_s2, %s1026_s14  ;;  %p1032_p4 = scmp.lt.s32.totalorder %s1026_s14, %s1026_s14 }
  0x2d   :  { %919 = vmatpush3.bf16.msra.mxu0 %v1117_v16  ;;  %871 = vmatpush3.bf16.msra.mxu1 %v1117_v16  ;;  %v1133_v30 = vpack.c.bf16 %v104_v25, %v101_v24  ;;  %v191_v33 = vsub.f32 %v69_v6, %v89_v11  ;;  %v198_v34 = vsub.f32 %v70_v7, %v92_v14  ;;  %v53_v7 = vlaneseq }
  0x2e   :  { %921 = vmatprep.subr.bf16.mxu0 %v1119_v19  ;;  %873 = vmatprep.subr.bf16.mxu1 %v1119_v19  ;;  %v178_v28 = vand.u32 4294901760, %v177_v26  ;;  %v185_v29 = vand.u32 4294901760, %v184_v27  ;;  %v205_v44 = vsub.f32 %v71_v12, %v95_v17  ;;  %v212_v45 = vsub.f32 %v72_v13, %v98_v18  ;;  %p1033_p5 = por %p1032_p4, %p1031_p3 }
  0x2f   :  { %59 = vperm.xlu0 %981, %v52_v20   ;;  %v192_v38 = vand.u32 4294901760, %v191_v33  ;;  %v199_v39 = vand.u32 4294901760, %v198_v34  ;;  %v219_v51 = vsub.f32 %v73_v21, %v101_v24  ;;  %v226_v52 = vsub.f32 %v74_v22, %v104_v25 }
  0x30   :  { %v179_v31 = vsub.f32 %v177_v26, %v178_v28  ;;  %v186_v32 = vsub.f32 %v184_v27, %v185_v29  ;;  %v1137_v35 = vpack.c.bf16 %v185_v29, %v178_v28  ;;  %v206_v48 = vand.u32 4294901760, %v205_v44  ;;  %v663_v28 = vld [vmem:[#allocation2 + $0x8] sm:$0xff]  ;;  %p1034_p6 = pnand %p1033_p5, %p1027_p2 }
  0x31   :  { %923 = vmatpush3.bf16.msra.mxu0 %v1119_v19  ;;  %875 = vmatpush3.bf16.msra.mxu1 %v1119_v19  ;;  %v936_v41 = vpack.c.bf16 %v199_v39, %v192_v38  ;;  %v193_v42 = vsub.f32 %v191_v33, %v192_v38  ;;  %v200_v43 = vsub.f32 %v198_v34, %v199_v39  ;;  %v213_v49 = vand.u32 4294901760, %v212_v45 }
  0x32   :  { %925 = vmatprep.subr.bf16.mxu0 %v1127_v23  ;;  %877 = vmatprep.subr.bf16.mxu1 %v1127_v23  ;;  %v180_v36 = vand.u32 4294901760, %v179_v31  ;;  %v187_v37 = vand.u32 4294901760, %v186_v32  ;;  %v207_v54 = vsub.f32 %v205_v44, %v206_v48  ;;  %v220_v56 = vand.u32 4294901760, %v219_v51  ;;  %v662_v32 = vld [vmem:[#allocation2] sm:$0xff] }
  0x33   :  { %v194_v46 = vand.u32 4294901760, %v193_v42  ;;  %v201_v47 = vand.u32 4294901760, %v200_v43  ;;  %v940_v53 = vpack.c.bf16 %v213_v49, %v206_v48  ;;  %v214_v55 = vsub.f32 %v212_v45, %v213_v49 }
  0x34   :  { %v884_v40 = vpack.c.bf16 %v187_v37, %v180_v36  ;;  %v227_v57 = vand.u32 4294901760, %v226_v52  ;;  %v208_v58 = vand.u32 4294901760, %v207_v54  ;;  %v221_v61 = vsub.f32 %v219_v51, %v220_v56 }
  0x35   :  { %927 = vmatpush3.bf16.msra.mxu0 %v1127_v23  ;;  %879 = vmatpush3.bf16.msra.mxu1 %v1127_v23  ;;  %v888_v50 = vpack.c.bf16 %v201_v47, %v194_v46  ;;  %v215_v59 = vand.u32 4294901760, %v214_v55  ;;  %v900_v3 = vpack.c.bf16 %v184_v27, %v177_v26  ;;  %v904_v4 = vpack.c.bf16 %v198_v34, %v191_v33 }
  0x36   :  { %929 = vmatprep.subr.bf16.mxu0 %v1133_v30  ;;  %881 = vmatprep.subr.bf16.mxu1 %v1133_v30  ;;  %v944_v60 = vpack.c.bf16 %v227_v57, %v220_v56  ;;  %v228_v62 = vsub.f32 %v226_v52, %v227_v57  ;;  %v222_v0 = vand.u32 4294901760, %v221_v61  ;;  %v908_v5 = vpack.c.bf16 %v212_v45, %v205_v44 }
  0x37   :  { %v892_v63 = vpack.c.bf16 %v215_v59, %v208_v58  ;;  %v912_v6 = vpack.c.bf16 %v226_v52, %v219_v51  ;;  %v54_v8 = vand.u32 127, %v53_v7 }
  0x38   :  { %v229_v1 = vand.u32 4294901760, %v228_v62 }
  0x39   :  { %931 = vmatpush3.bf16.msra.mxu0 %v1133_v30  ;;  %883 = vmatpush3.bf16.msra.mxu1 %v1133_v30 }
  0x3a   :  { %933 = vmatprep.subr.bf16.mxu0 %v1137_v35  ;;  %885 = vmatprep.subr.bf16.mxu1 %v884_v40  ;;  %v896_v2 = vpack.c.bf16 %v229_v1, %v222_v0 }
  0xaa   :  { %v57_v9 = vpop.permute.xlu0 %56 }
  0xab   :  { %vm61_vm5 = vcmp.eq.s32.totalorder %v54_v8, %v57_v9 }
  0xac   :  { %v686_v11 = vsel %vm61_vm5, 1.0, %v1059_v10 }
  0xad   :  { %v77_v12 = vsel %vm75_vm4, %v686_v11, 0 }
  0xae   :  { %v156_v13 = vsub.f32 %v77_v12, %v77_v12  ;;  %v60_v14 = vpop.permute.xlu0 %59 }
  0xaf   :  { %vm62_vm6 = vcmp.eq.s32.totalorder %v54_v8, %v60_v14 }
  0xb0   :  { %v687_v15 = vsel %vm62_vm6, 1.0, %v1059_v10  ;;  %v157_v17 = vand.u32 4294901760, %v156_v13 }
  0xb1   :  { %v80_v18 = vsel %vm75_vm4, %v687_v15, 0 }
  0xb2   :  { %v166_v20 = vsub.f32 %v80_v18, %v80_v18  ;;  %827 = vmatprep.mubr.f32.mxu0 %v157_v17  ;;  %v158_v21 = vsub.f32 %v156_v13, %v157_v17 }
  0xb4   :  { %v159_v22 = vand.u32 4294901760, %v158_v21  ;;  %v167_v24 = vand.u32 4294901760, %v166_v20 }
  0xb6   :  { %770 = vmatprep.mubr.f32.mxu1 %v159_v22  ;;  %828 = vmatmul.mubr.f32.vlgmr.msra.gmra.mrb[0].mxu0 %v167_v24  ;;  %v168_v25 = vsub.f32 %v166_v20, %v167_v24 }
  0xb7   :  { %935 = vmatpush3.bf16.msra.mxu0 %v1137_v35  ;;  %846 = vmatprep.mubr.msk.f32.mxu0 %vm75_vm4, %v686_v11 }
  0xb8   :  { %937 = vmatprep.subr.bf16.mxu0 %v936_v41  ;;  %v169_v26 = vand.u32 4294901760, %v168_v25 }
  0xba   :  { %771 = vmatmul.mubr.f32.vlgmr.msra.gmra.mrb[0].mxu1 %v169_v26 }
  0xbb   :  { %887 = vmatpush3.bf16.msra.mxu1 %v884_v40  ;;  %939 = vmatpush3.bf16.msra.mxu0 %v936_v41 }
  0xbc   :  { %789 = vmatprep.mubr.msk.f32.mxu1 %vm75_vm4, %v686_v11  ;;  %889 = vmatprep.subr.bf16.mxu1 %v888_v50 }
  0xbd   :  { %941 = vmatprep.subr.bf16.mxu0 %v940_v53 }
  0xbf   :  { %891 = vmatpush3.bf16.msra.mxu1 %v888_v50  ;;  %943 = vmatpush3.bf16.msra.mxu0 %v940_v53 }
  0xc0   :  { %893 = vmatprep.subr.bf16.mxu1 %v892_v63  ;;  %945 = vmatprep.subr.bf16.mxu0 %v944_v60 }
  0xc3   :  { %895 = vmatpush3.bf16.msra.mxu1 %v892_v63  ;;  %947 = vmatpush3.bf16.msra.mxu0 %v944_v60 }
  0xc4   :  { %897 = vmatprep.subr.bf16.mxu1 %v896_v2  ;;  %949 = vmatprep.subr.bf16.mxu0 %v1117_v16 }
  0xc6   :  { %847 = vmatmul.mubr.msk.f32.vlgmr.msra.gmra.mrb[0].mxu0 %vm75_vm4, %v687_v15 }
  0xc7   :  { %899 = vmatpush3.bf16.msra.mxu1 %v896_v2  ;;  %951 = vmatpush3.bf16.msra.mxu0 %v1117_v16 }
  0xc8   :  { %865 = vmatprep.mubr.msk.f32.mxu0 %vm75_vm4, %v686_v11  ;;  %901 = vmatprep.subr.bf16.mxu1 %v900_v3 }
  0xc9   :  { %953 = vmatprep.subr.bf16.mxu0 %v1119_v19 }
  0xca   :  { %790 = vmatmul.mubr.msk.f32.vlgmr.msra.gmra.mrb[0].mxu1 %vm75_vm4, %v687_v15 }
  0xcb   :  { %903 = vmatpush3.bf16.msra.mxu1 %v900_v3  ;;  %808 = vmatprep.mubr.f32.mxu1 %v156_v13 }
  0xcc   :  { %955 = vmatpush3.bf16.msra.mxu0 %v1119_v19  ;;  %905 = vmatprep.subr.bf16.mxu1 %v904_v4 }
  0xcd   :  { %957 = vmatprep.subr.bf16.mxu0 %v1127_v23 }
  0xcf   :  { %907 = vmatpush3.bf16.msra.mxu1 %v904_v4 }
  0xd0   :  { %959 = vmatpush3.bf16.msra.mxu0 %v1127_v23  ;;  %909 = vmatprep.subr.bf16.mxu1 %v908_v5 }
  0xd1   :  { %961 = vmatprep.subr.bf16.mxu0 %v1133_v30 }
  0xd3   :  { %911 = vmatpush3.bf16.msra.mxu1 %v908_v5 }
  0xd4   :  { %963 = vmatpush3.bf16.msra.mxu0 %v1133_v30  ;;  %913 = vmatprep.subr.bf16.mxu1 %v912_v6 }
  0xd7   :  { %866 = vmatmul.mubr.msk.f32.vlgmr.msra.gmra.mrb[0].mxu0 %vm75_vm4, %v687_v15  ;;  %915 = vmatpush3.bf16.msra.mxu1 %v912_v6 }
  0xda   :  { %809 = vmatmul.mubr.f32.vlgmr.msra.gmra.mrb[0].mxu1 %v166_v20 }
 0x1aa   :  { %v867_v16 = vpop.f32.mrb[0].mxu0 }
 0x1ab   :  { %v652_v27 = vpop.f32.mrb[1].mxu0 }
 0x1ad   :  { %v810_v19 = vpop.f32.mrb[0].mxu1 }
 0x1ae   :  { %v964_v29 = vadd.f32 %v867_v16, %v810_v19  ;;  %v376_v31 = vpop.f32.mrb[1].mxu1 }
 0x1af   :  { %v965_v23 = vadd.f32 %v652_v27, %v376_v31 }
 0x1b0   :  { %v665_v33 = vadd.f32 %v964_v29, %v663_v28 }
 0x1b1   :  { %v664_v34 = vadd.f32 %v965_v23, %v662_v32 }
 0x1b2   :  { %667 = vst [vmem:[#allocation7 + $0x8] sm:$0xff] %v665_v33 }
 0x1b3   :  { %666 = vst [vmem:[#allocation7] sm:$0xff] %v664_v34 }
 0x1b4   :  { %1037 = shalt.err (!%p1034_p6)
}
 0x1b5   :  { %s1038_s17 = scalar_lea.hbm %s1179_s3, 256 }
 0x1b6   :  { %p1039_p7 = scmp.ne.s32.totalorder %s1179_s3, %s1038_s17  ;;  %p1042_p8 = scmp.lt.u32.totalorder %s1038_s17, %s1179_s3 }
 0x1b8   :  { %p1044_p9 = pnand %p1042_p8, %p1039_p7 }
 0x1ba   :  { %1047 = shalt.err (!%p1044_p9)
}
 0x1bb   :  { %679 = dma.vmem_to_hbm [thread:$0]  %s674_s2, 256, %s1179_s3, [#allocation4], %s1055_s22, %s1055_s22, %s1056_s23  }
 0x1bc   :  { %1052 = dma.done.wait [#allocation4], 256  }
 0x1bd   :  { %1053 = vsyncadd [#allocation4], 4294967040 }
 0x1be   :  { %683 = vsyncpa [#allocation3], 1 }
 0x1bf   :  { %684 = vsyncpa [#allocation6], 1 }
 0x1c0   :  { %685 = vsyncpa [#allocation4], 1 }

</bundles_post_ra>
